<compile_context>
chip_gen: v7x
topology: tpu7x:2x2x1
jax: 0.10.0
libtpu: 0.0.40
codegen_flags: <defaults>
</compile_context>

<pallas_src>
import functools

import jax
import jax.numpy as jnp
from jax.experimental import pallas as pl
from jax.experimental.pallas import tpu as pltpu

BN_EPS = 1e-5
LANE = 128
SUBLANE = 8


def _round_up(v, m):
    return (v + m - 1) // m * m


def _sublane_multiple(dtype):
    """Packed sublane multiple: 8 for 32-bit, 16 for bf16, 32 for 8-bit."""
    bits = jnp.dtype(dtype).itemsize * 8
    return max(SUBLANE, SUBLANE * 32 // bits)


def _vmem_tile_bytes(shape, dtype):
    """Bytes of a VMEM-resident array including lane/sublane layout padding."""
    shape = tuple(shape)
    if len(shape) == 1:
        shape = (1,) + shape
    lead = 1
    for s in shape[:-2]:
        lead *= s
    sub = _sublane_multiple(dtype)
    return (lead * _round_up(shape[-2], sub) * _round_up(shape[-1], LANE)
            * jnp.dtype(dtype).itemsize)


# ----------------------------------------------------------------------------
# Fused Pallas kernel (whole forward in one call)
# ----------------------------------------------------------------------------
def make_fused_kernel(num_conv_layers, d_emb, out_dim, out_pad, compute_dtype):
    """All layers + final w_x scaling; BN/bias are pre-folded into W'/b'.

    The big A@x matmuls use compute_dtype operands (f32 accumulation); the
    small DxD weight matmuls keep an f32 LHS so rounding does not compound.
    """
    stream_stores = (d_emb % LANE == 0)   # per-layer unmasked 128-lane stores

    def kernel(eps_ref,   # SMEM  (max(num_conv,1),)       per-conv-layer eps
               x0_ref,    # VMEM  [N_pad, D_in]  f32       input features
               a_ref,     # VMEM  [N_pad, N_pad] cdtype    normalized adjacency
               w0_ref,    # VMEM  [D_in, D] f32            folded layer-0 weight
               b0_ref,    # VMEM  [1, D]    f32            folded layer-0 bias
               ws_ref,    # VMEM  [num_conv, D, D] f32     folded conv weights
               bs_ref,    # VMEM  [num_conv, 1, D] f32     folded conv biases
               wx_ref,    # VMEM  [N_pad, 1] f32           per-node w scale
               o_ref):    # VMEM  [N_pad, out_pad] f32     lane-dense output
        n_pad = x0_ref.shape[0]

        # layer 0: relu(x @ W0' + b0')  (tiny matmul, kept in f32)
        x = jnp.maximum(
            jnp.dot(x0_ref[...], w0_ref[...],
                    preferred_element_type=jnp.float32) + b0_ref[...],
            0.0)

        a = a_ref[...]

        if stream_stores:
            # single hoisted broadcast of wx, reused for every layer store
            wx_b = jnp.broadcast_to(wx_ref[...], (n_pad, d_emb))
            o_ref[:, pl.ds(0, d_emb)] = x * wx_b
            for l in range(num_conv_layers):
                # agg_i = mean_{j in N(i)} x_j * edge_attr[e,0] == (A_norm@x)_i
                agg = jnp.dot(a, x.astype(compute_dtype),
                              preferred_element_type=jnp.float32)
                h_in = (1.0 + eps_ref[l]) * x + agg
                h = jnp.dot(h_in, ws_ref[l],
                            preferred_element_type=jnp.float32) + bs_ref[l]
                x = jnp.maximum(h, 0.0)
                o_ref[:, pl.ds((l + 1) * d_emb, d_emb)] = x * wx_b
        else:
            outs = [x]
            for l in range(num_conv_layers):
                agg = jnp.dot(a, x.astype(compute_dtype),
                              preferred_element_type=jnp.float32)
                h_in = (1.0 + eps_ref[l]) * x + agg
                h = jnp.dot(h_in, ws_ref[l],
                            preferred_element_type=jnp.float32) + bs_ref[l]
                x = jnp.maximum(h, 0.0)
                outs.append(x)
            if out_pad > out_dim:
                outs.append(jnp.zeros((n_pad, out_pad - out_dim), jnp.float32))
            # one lane-dense store; wx broadcast happens exactly once here
            o_ref[...] = jnp.concatenate(outs, axis=1) * wx_ref[...]

    return kernel


# ----------------------------------------------------------------------------
# Trace-time glue
# ----------------------------------------------------------------------------
def fold_bn(W, b, gamma, beta, mean, var):
    """Fold eval-mode BatchNorm1d (+ bias) into the linear weights."""
    s = gamma * jax.lax.rsqrt(var + BN_EPS)          # [1, D]
    return W * s, (b - mean) * s + beta


def build_mean_adjacency(edge_index, edge_attr, num_nodes, dtype=jnp.float32):
    """Dense normalized adjacency s.t. (A @ x)_i = scatter_mean of x_j*ea[e,0].

    Accumulated in f32; emitted directly in the kernel's compute dtype so the
    HBM array the kernel DMAs is already bf16 on v6e/v7x.
    """
    src = edge_index[0]
    dst = edge_index[1]
    a = jnp.zeros((num_nodes, num_nodes), jnp.float32).at[dst, src].add(edge_attr[:, 0])
    deg = jnp.zeros((num_nodes,), jnp.float32).at[dst].add(1.0)
    return (a / jnp.maximum(deg, 1.0)[:, None]).astype(dtype)


def trento_dgn_forward(params, x_raw, edge_index, edge_attr,
                       compute_dtype=jnp.bfloat16):
    layers = params["layers"]
    num_layers = len(layers)
    num_conv = num_layers - 1
    D = layers[0]["W"].shape[1]

    # x = cat(x[:, :9], x[:, -1].unsqueeze(1))
    x = jnp.concatenate([x_raw[:, :9], x_raw[:, -1:]], axis=1)
    idx = x[:, -1].astype(jnp.int32)
    w_x = params["w"][idx]                           # [N, 1]

    N, D_in = x.shape
    N_pad = _round_up(N, _sublane_multiple(compute_dtype))   # 16 for bf16
    out_dim = D * num_layers
    out_pad = _round_up(out_dim, LANE)

    # adjacency built on the padded node count (padded rows/cols stay zero);
    # emitted in compute_dtype so the dominant operand is half-width on v6e/v7x.
    a_norm = build_mean_adjacency(edge_index, edge_attr, N_pad,
                                  dtype=compute_dtype)

    # pad node axis to the packed sublane multiple
    x0 = jnp.zeros((N_pad, D_in), jnp.float32).at[:N].set(x)
    wx = jnp.zeros((N_pad, 1), jnp.float32).at[:N].set(w_x)

    # fold BN + bias into W'/b' at trace time (weights stay f32 in-kernel)
    w0, b0 = fold_bn(layers[0]["W"], layers[0]["b"], layers[0]["gamma"],
                     layers[0]["beta"], layers[0]["mean"], layers[0]["var"])
    if num_conv > 0:
        ws_l, bs_l, eps_l = [], [], []
        for layer in layers[1:]:
            w_i, b_i = fold_bn(layer["W"], layer["b"], layer["gamma"],
                               layer["beta"], layer["mean"], layer["var"])
            ws_l.append(w_i)
            bs_l.append(b_i)
            eps_l.append(layer["eps"].reshape(()))
        ws = jnp.stack(ws_l)                         # [num_conv, D, D]
        bs = jnp.stack(bs_l)                         # [num_conv, 1, D]
        eps = jnp.stack(eps_l)                       # [num_conv]
    else:  # dummies so operand shapes stay non-empty
        ws = jnp.zeros((1, D, D), jnp.float32)
        bs = jnp.zeros((1, 1, D), jnp.float32)
        eps = jnp.zeros((1,), jnp.float32)

    kernel = make_fused_kernel(num_conv, D, out_dim, out_pad, compute_dtype)

    vmem_spec = pl.BlockSpec(memory_space=pltpu.MemorySpace.VMEM)
    smem_spec = pl.BlockSpec(memory_space=pltpu.MemorySpace.SMEM)

    # VMEM budget sized from the (layout-padded) operands + live activations.
    operand_vmem = (
        _vmem_tile_bytes((N_pad, D_in), jnp.float32) +
        _vmem_tile_bytes((N_pad, N_pad), compute_dtype) +
        _vmem_tile_bytes((D_in, D), jnp.float32) +
        _vmem_tile_bytes((1, D), jnp.float32) +
        _vmem_tile_bytes(ws.shape, jnp.float32) +
        _vmem_tile_bytes(bs.shape, jnp.float32) +
        _vmem_tile_bytes((N_pad, 1), jnp.float32) +
        _vmem_tile_bytes((N_pad, out_pad), jnp.float32))
    live_acts = 6 * _vmem_tile_bytes((N_pad, max(D, LANE)), jnp.float32)
    vmem_limit = int(min(64 << 20,
                         max(16 << 20, 2 * operand_vmem + live_acts + (2 << 20))))

    # advisory cost so XLA overlaps the wrapper-side scatter with this call
    flops = (2 * N_pad * D_in * D
             + num_conv * (2 * N_pad * N_pad * D + 2 * N_pad * D * D))
    bytes_accessed = (
        x0.size * 4 + a_norm.size * jnp.dtype(compute_dtype).itemsize
        + w0.size * 4 + b0.size * 4 + ws.size * 4 + bs.size * 4 + wx.size * 4
        + N_pad * out_pad * 4)
    cost = pl.CostEstimate(flops=int(flops), transcendentals=0,
                           bytes_accessed=int(bytes_accessed))

    # TODO(synk): for large graphs the dense [N,N] adjacency must be tiled
    # (node-row "parallel" axis x neighbor-col "arbitrary" axis with a VMEM
    # accumulator, or a CSR/scalar-prefetch gather path) so A streams through
    # VMEM instead of being fully resident; this single-block design is sized
    # for small graphs where bf16 A fits comfortably under vmem_limit.
    out = pl.pallas_call(
        kernel,
        out_shape=jax.ShapeDtypeStruct((N_pad, out_pad), jnp.float32),
        in_specs=[smem_spec] + [vmem_spec] * 7,
        out_specs=vmem_spec,
        compiler_params=pltpu.CompilerParams(vmem_limit_bytes=vmem_limit),
        cost_estimate=cost,
    )(eps, x0, a_norm, w0, b0, ws, bs, wx)

    return out[:N, :out_dim]


# ----------------------------------------------------------------------------
# Parameter init (matches the PyTorch module's structure; BN in eval mode)
# ----------------------------------------------------------------------------
def init_params(key, dim_node_sel, dim_embedding, num_layers):
    params = {}
    key, k = jax.random.split(key)
    bound = (6.0 / (2 + 1)) ** 0.5                   # xavier_uniform for [2,1]
    params["w"] = jax.random.uniform(k, (2, 1), jnp.float32, -bound, bound)

    layers = []
    for i in range(num_layers):
        dim_in = dim_node_sel if i == 0 else dim_embedding
        key, k1, k2, k3, k4 = jax.random.split(key, 5)
        lim = (1.0 / dim_in) ** 0.5
        layer = {
            "W": jax.random.uniform(k1, (dim_in, dim_embedding), jnp.float32, -lim, lim),
            "b": jax.random.uniform(k2, (1, dim_embedding), jnp.float32, -lim, lim),
            # BatchNorm1d (eval mode) parameters / running stats
            "gamma": 1.0 + 0.01 * jax.random.normal(k3, (1, dim_embedding), jnp.float32),
            "beta": 0.01 * jax.random.normal(k4, (1, dim_embedding), jnp.float32),
            "mean": jnp.zeros((1, dim_embedding), jnp.float32),
            "var": jnp.ones((1, dim_embedding), jnp.float32),
        }
        if i > 0:
            layer["eps"] = jnp.full((1, 1), 0.1, jnp.float32)   # TrentoConv eps
        layers.append(layer)
    params["layers"] = layers
    return params


# Pure-JAX reference (f32, highest matmul precision) for correctness checks.
def trento_dgn_reference(params, x_raw, edge_index, edge_attr):
    hp = jax.lax.Precision.HIGHEST
    x = jnp.concatenate([x_raw[:, :9], x_raw[:, -1:]], axis=1)
    idx = x[:, -1].astype(jnp.int32)
    w_x = params["w"][idx]
    N = x.shape[0]
    a_norm = build_mean_adjacency(edge_index, edge_attr, N)
    x_all = []
    for i, layer in enumerate(params["layers"]):
        if i == 0:
            h = jnp.dot(x, layer["W"], precision=hp) + layer["b"]
        else:
            h_in = (1.0 + layer["eps"]) * x + jnp.dot(a_norm, x, precision=hp)
            h = jnp.dot(h_in, layer["W"], precision=hp) + layer["b"]
        h = (h - layer["mean"]) * jax.lax.rsqrt(layer["var"] + BN_EPS) * layer["gamma"] + layer["beta"]
        x = jnp.maximum(h, 0.0)
        x_all.append(x)
    return jnp.concatenate(x_all, axis=1) * w_x


def _make_graph(key, N, E, dim_node_features, dim_edge_features):
    k1, k2, k3, k4 = jax.random.split(key, 4)
    x_feat = jax.random.normal(k1, (N, dim_node_features - 1), jnp.float32)
    x_label = jax.random.randint(k2, (N, 1), 0, 2).astype(jnp.float32)  # last col in {0,1}
    x_raw = jnp.concatenate([x_feat, x_label], axis=1)
    edge_index = jax.random.randint(k3, (2, E), 0, N, dtype=jnp.int32)
    edge_attr = jax.random.normal(k4, (E, dim_edge_features), jnp.float32)
    return x_raw, edge_index, edge_attr


# ----------------------------------------------------------------------------
if __name__ == "__main__":
    key = jax.random.PRNGKey(0)
    kg1, kg2, kp1, kp2 = jax.random.split(key, 4)

    # --- case 1: toy config D=32 (lane-narrow -> single concat store path) ---
    N, E = 16, 32
    dim_node_features, dim_edge_features = 12, 2
    num_layers, dim_embedding = 3, 32

    x_raw, edge_index, edge_attr = _make_graph(kg1, N, E, dim_node_features,
                                               dim_edge_features)
    params = init_params(kp1, dim_node_sel=10, dim_embedding=dim_embedding,
                         num_layers=num_layers)
    ref = trento_dgn_reference(params, x_raw, edge_index, edge_attr)

    # default bf16-A path (f32 accumulation; weight matmuls keep f32 LHS)
    fwd_bf16 = jax.jit(functools.partial(trento_dgn_forward, params,
                                         compute_dtype=jnp.bfloat16))
    out_bf16 = fwd_bf16(x_raw, edge_index, edge_attr)
    jax.block_until_ready(out_bf16)
    assert out_bf16.shape == (N, dim_embedding * num_layers)
    assert jnp.allclose(out_bf16, ref, rtol=3e-2, atol=3e-2)

    # strict f32 MXU path
    fwd_f32 = jax.jit(functools.partial(trento_dgn_forward, params,
                                        compute_dtype=jnp.float32))
    out_f32 = fwd_f32(x_raw, edge_index, edge_attr)
    jax.block_until_ready(out_f32)
    assert jnp.allclose(out_f32, ref, rtol=5e-3, atol=5e-3)

    # --- case 2: D=128 exercises the per-layer streaming-store path ---
    N2, E2 = 24, 64
    num_layers2, dim_embedding2 = 2, 128
    x_raw2, edge_index2, edge_attr2 = _make_graph(kg2, N2, E2,
                                                  dim_node_features,
                                                  dim_edge_features)
    params2 = init_params(kp2, dim_node_sel=10, dim_embedding=dim_embedding2,
                          num_layers=num_layers2)
    ref2 = trento_dgn_reference(params2, x_raw2, edge_index2, edge_attr2)
    fwd2 = jax.jit(functools.partial(trento_dgn_forward, params2,
                                     compute_dtype=jnp.bfloat16))
    out2 = fwd2(x_raw2, edge_index2, edge_attr2)
    jax.block_until_ready(out2)
    assert out2.shape == (N2, dim_embedding2 * num_layers2)
    assert jnp.allclose(out2, ref2, rtol=3e-2, atol=3e-2)

    print("KERNEL_OK")
</pallas_src>

<mosaic_0001>
module attributes {stable_mosaic.version = 11 : i64} {
  func.func private @main(%arg0: i32) attributes {dimension_semantics = [#tpu.dimension_semantics<core_parallel>], iteration_bounds = array<i64: 2>, tpu.core_type = #tpu.core_type<sc_scalar_subcore>, window_params = []} {
    return
  }
}

module attributes {stable_mosaic.version = 11 : i64} {
  func.func private @main(%arg0: i32) attributes {dimension_semantics = [#tpu.dimension_semantics<core_parallel>], iteration_bounds = array<i64: 2>, tpu.core_type = #tpu.core_type<sc_scalar_subcore>, window_params = []} {
    return
  }
}

module attributes {stable_mosaic.version = 11 : i64} {
  func.func @kernel(%arg0: memref<2xf32, #tpu.memory_space<smem>>, %arg1: memref<16x10xf32, #tpu.memory_space<vmem>>, %arg2: memref<16x16xbf16, #tpu.memory_space<vmem>>, %arg3: memref<10x32xf32, #tpu.memory_space<vmem>>, %arg4: memref<1x32xf32, #tpu.memory_space<vmem>>, %arg5: memref<2x32x32xf32, #tpu.memory_space<vmem>>, %arg6: memref<2x1x32xf32, #tpu.memory_space<vmem>>, %arg7: memref<16x1xf32, #tpu.memory_space<vmem>>, %arg8: memref<16x128xf32, #tpu.memory_space<vmem>>) attributes {dimension_semantics = [], scalar_prefetch = 0 : i64, scratch_operands = 0 : i64, tpu.core_type = #tpu.core_type<tc>} {
    %c0 = arith.constant 0 : index
    %c0_0 = arith.constant 0 : index
    %0 = vector.load %arg1[%c0, %c0_0] : memref<16x10xf32, #tpu.memory_space<vmem>>, vector<16x10xf32>
    %c0_1 = arith.constant 0 : index
    %c0_2 = arith.constant 0 : index
    %1 = vector.load %arg3[%c0_1, %c0_2] : memref<10x32xf32, #tpu.memory_space<vmem>>, vector<10x32xf32>
    %cst = arith.constant dense<0.000000e+00> : vector<16x32xf32>
    %2 = tpu.matmul %0, %1, %cst {dimension_numbers = #tpu.dot_dimension_numbers<[1], [0], [0], [1], [0, 0, 1, 1], [], []>} : vector<16x10xf32>, vector<10x32xf32>, vector<16x32xf32> -> vector<16x32xf32>
    %c0_3 = arith.constant 0 : index
    %c0_4 = arith.constant 0 : index
    %3 = vector.load %arg4[%c0_3, %c0_4] : memref<1x32xf32, #tpu.memory_space<vmem>>, vector<1x32xf32>
    %4 = vector.broadcast %3 : vector<1x32xf32> to vector<16x32xf32>
    %5 = arith.addf %2, %4 : vector<16x32xf32>
    %cst_5 = arith.constant 0.000000e+00 : f32
    %6 = vector.broadcast %cst_5 : f32 to vector<16x32xf32>
    %7 = arith.maximumf %5, %6 : vector<16x32xf32>
    %c0_6 = arith.constant 0 : index
    %c0_7 = arith.constant 0 : index
    %8 = vector.load %arg2[%c0_6, %c0_7] : memref<16x16xbf16, #tpu.memory_space<vmem>>, vector<16x16xbf16>
    %9 = arith.truncf %7 : vector<16x32xf32> to vector<16x32xbf16>
    %cst_8 = arith.constant dense<0.000000e+00> : vector<16x32xf32>
    %10 = tpu.matmul %8, %9, %cst_8 {dimension_numbers = #tpu.dot_dimension_numbers<[1], [0], [0], [1], [0, 0, 1, 1], [], []>} : vector<16x16xbf16>, vector<16x32xbf16>, vector<16x32xf32> -> vector<16x32xf32>
    %c0_9 = arith.constant 0 : index
    %11 = memref.load %arg0[%c0_9] : memref<2xf32, #tpu.memory_space<smem>>
    %cst_10 = arith.constant 1.000000e+00 : f32
    %12 = arith.addf %cst_10, %11 : f32
    %13 = vector.broadcast %12 : f32 to vector<16x32xf32>
    %14 = arith.mulf %13, %7 : vector<16x32xf32>
    %15 = arith.addf %14, %10 : vector<16x32xf32>
    %c0_11 = arith.constant 0 : index
    %c0_12 = arith.constant 0 : index
    %c0_13 = arith.constant 0 : index
    %16 = vector.load %arg5[%c0_11, %c0_12, %c0_13] : memref<2x32x32xf32, #tpu.memory_space<vmem>>, vector<1x32x32xf32>
    %17 = vector.shape_cast %16 : vector<1x32x32xf32> to vector<32x32xf32>
    %cst_14 = arith.constant dense<0.000000e+00> : vector<16x32xf32>
    %18 = tpu.matmul %15, %17, %cst_14 {dimension_numbers = #tpu.dot_dimension_numbers<[1], [0], [0], [1], [0, 0, 1, 1], [], []>} : vector<16x32xf32>, vector<32x32xf32>, vector<16x32xf32> -> vector<16x32xf32>
    %c0_15 = arith.constant 0 : index
    %c0_16 = arith.constant 0 : index
    %c0_17 = arith.constant 0 : index
    %19 = vector.load %arg6[%c0_15, %c0_16, %c0_17] : memref<2x1x32xf32, #tpu.memory_space<vmem>>, vector<1x1x32xf32>
    %20 = vector.shape_cast %19 : vector<1x1x32xf32> to vector<1x32xf32>
    %21 = vector.broadcast %20 : vector<1x32xf32> to vector<16x32xf32>
    %22 = arith.addf %18, %21 : vector<16x32xf32>
    %cst_18 = arith.constant 0.000000e+00 : f32
    %23 = vector.broadcast %cst_18 : f32 to vector<16x32xf32>
    %24 = arith.maximumf %22, %23 : vector<16x32xf32>
    %25 = arith.truncf %24 : vector<16x32xf32> to vector<16x32xbf16>
    %cst_19 = arith.constant dense<0.000000e+00> : vector<16x32xf32>
    %26 = tpu.matmul %8, %25, %cst_19 {dimension_numbers = #tpu.dot_dimension_numbers<[1], [0], [0], [1], [0, 0, 1, 1], [], []>} : vector<16x16xbf16>, vector<16x32xbf16>, vector<16x32xf32> -> vector<16x32xf32>
    %c1 = arith.constant 1 : index
    %27 = memref.load %arg0[%c1] : memref<2xf32, #tpu.memory_space<smem>>
    %cst_20 = arith.constant 1.000000e+00 : f32
    %28 = arith.addf %cst_20, %27 : f32
    %29 = vector.broadcast %28 : f32 to vector<16x32xf32>
    %30 = arith.mulf %29, %24 : vector<16x32xf32>
    %31 = arith.addf %30, %26 : vector<16x32xf32>
    %c1_21 = arith.constant 1 : index
    %c0_22 = arith.constant 0 : index
    %c0_23 = arith.constant 0 : index
    %32 = vector.load %arg5[%c1_21, %c0_22, %c0_23] : memref<2x32x32xf32, #tpu.memory_space<vmem>>, vector<1x32x32xf32>
    %33 = vector.shape_cast %32 : vector<1x32x32xf32> to vector<32x32xf32>
    %cst_24 = arith.constant dense<0.000000e+00> : vector<16x32xf32>
    %34 = tpu.matmul %31, %33, %cst_24 {dimension_numbers = #tpu.dot_dimension_numbers<[1], [0], [0], [1], [0, 0, 1, 1], [], []>} : vector<16x32xf32>, vector<32x32xf32>, vector<16x32xf32> -> vector<16x32xf32>
    %c1_25 = arith.constant 1 : index
    %c0_26 = arith.constant 0 : index
    %c0_27 = arith.constant 0 : index
    %35 = vector.load %arg6[%c1_25, %c0_26, %c0_27] : memref<2x1x32xf32, #tpu.memory_space<vmem>>, vector<1x1x32xf32>
    %36 = vector.shape_cast %35 : vector<1x1x32xf32> to vector<1x32xf32>
    %37 = vector.broadcast %36 : vector<1x32xf32> to vector<16x32xf32>
    %38 = arith.addf %34, %37 : vector<16x32xf32>
    %cst_28 = arith.constant 0.000000e+00 : f32
    %39 = vector.broadcast %cst_28 : f32 to vector<16x32xf32>
    %40 = arith.maximumf %38, %39 : vector<16x32xf32>
    %cst_29 = arith.constant 0.000000e+00 : f32
    %41 = vector.broadcast %cst_29 : f32 to vector<16x32xf32>
    %42 = tpu.concatenate %7, %24, %40, %41 in 1 : vector<16x32xf32>, vector<16x32xf32>, vector<16x32xf32>, vector<16x32xf32> -> vector<16x128xf32>
    %c0_30 = arith.constant 0 : index
    %c0_31 = arith.constant 0 : index
    %43 = vector.load %arg7[%c0_30, %c0_31] : memref<16x1xf32, #tpu.memory_space<vmem>>, vector<16x1xf32>
    %44 = vector.broadcast %43 : vector<16x1xf32> to vector<16x128xf32>
    %45 = arith.mulf %42, %44 : vector<16x128xf32>
    %c0_32 = arith.constant 0 : index
    %c0_33 = arith.constant 0 : index
    %46 = vector.load %arg8[%c0_32, %c0_33] : memref<16x128xf32, #tpu.memory_space<vmem>>, vector<16x128xf32>
    tpu.vector_store %arg8[%c0_32, %c0_33], %45 {strides = array<i32>} : memref<16x128xf32, #tpu.memory_space<vmem>>, vector<16x128xf32>,
    return
  }
}

</mosaic_0001>

<bundles_post_ra>
// kernel: trento_dgn_forward.1
= control target key start
LH: loop header
LB: loop body
LE: loop exit
PB: predicated region body
PF: predicated region fallthrough
CT: control target
= control target key end

     0   :  { %13 = vsyncpa [#allocation4], 0  ;;  %s796_s0 = inlined_call_operand.vmem [shape: f32[2], index: 0, kind: input, shape index: {}]   ;;  %s797_s1 = inlined_call_operand.vmem [shape: f32[16,10], index: 1, kind: input, shape index: {}]   ;;  %s798_s2 = inlined_call_operand.vmem [shape: bf16[16,16], index: 2, kind: input, shape index: {}]   ;;  %s799_s3 = inlined_call_operand.vmem [shape: f32[10,32], index: 3, kind: input, shape index: {}]   ;;  %s800_s4 = inlined_call_operand.vmem [shape: f32[1,32], index: 4, kind: input, shape index: {}]   ;;  %s801_s5 = inlined_call_operand.vmem [shape: f32[2,32,32], index: 5, kind: input, shape index: {}]   ;;  %s802_s6 = inlined_call_operand.vmem [shape: f32[2,1,32], index: 6, kind: input, shape index: {}]   ;;  %s803_s7 = inlined_call_operand.vmem [shape: f32[16,1], index: 7, kind: input, shape index: {}]   ;;  %s804_s8 = inlined_call_operand.hbm [shape: f32[16,128], index: 8, kind: output, shape index: {}]  }
   0x1   :  { %14 = vsyncpa [#allocation3], 0  ;;  %s21_s29 = sshll.u32 %s796_s0, 4  ;;  %s22_s29 = int_to_ptr.vmem [resolvable:$true] %s21_s29 }
   0x2   :  { %s614_s30 = scalar_lea.vmem %s22_s29, 16  ;;  %p619_p1 = scmp.lt.s32.totalorder %s22_s29, %s22_s29 }
   0x3   :  { %p615_p0 = scmp.ne.s32.totalorder %s22_s29, %s614_s30  ;;  %p620_p2 = scmp.lt.s32.totalorder %s614_s30, %s614_s30 }
   0x5   :  { %p621_p3 = por %p620_p2, %p619_p1 }
   0x7   :  { %p622_p4 = pnand %p621_p3, %p615_p0 }
   0x9   :  { %625 = shalt.err (!%p622_p4)
}
   0xa   :  { %s652_s9 = smov [#allocation2]  }
   0xb   :  { %24 = dma.vmem_to_smem %s22_s29, 16, %s652_s9, [#allocation4]  }
   0xc   :  { %648 = dma.done.wait [#allocation4], 16  }
   0xd   :  { %649 = vsyncadd [#allocation4], 4294967280 }
   0xe   :  { %42 = sfence }
   0xf   :  { %v46_v0 = vld [vmem:[%s799_s3] sm:$0xff]  ;;  %v47_v1 = vld [vmem:[%s799_s3 + $0x8] sm:$0x3]  ;;  %vm62_vm0 = vcmask 1041408   ;;  %vm653_vm1 = vmmov 1   ;;  %vm55_vm3 = vcmask 80896  }
  0x10   :  { %v44_v2 = vld [vmem:[%s797_s1] sm:$0xff]  ;;  %v580_v3 = vpack.c.bf16 %v47_v1, %v46_v0  ;;  %vm581_vm2 = vmpackc.low %vm62_vm0, %vm653_vm1  ;;  %v45_v4 = vld [vmem:[%s797_s1 + $0x8] sm:$0xff]  ;;  %v654_v5 = vmov 0.0   ;;  %vm655_vm4 = vmmov 0   ;;  %vm151_vm5 = vcmask 130048   ;;  %s196_s26 = sld [smem:[#allocation2]] }
  0x11   :  { %543 = vmatprep.mubr.msk.f32.mxu0 %vm55_vm3, %v44_v2  ;;  %546 = vmatprep.subr.bf16.mxu1 %v654_v5  ;;  %v203_v6 = vld [vmem:[%s801_s5] sm:$0xff]  ;;  %v204_v7 = vld [vmem:[%s801_s5 + $0x8] sm:$0xff]  ;;  %v205_v18 = vld [vmem:[%s801_s5 + $0x10] sm:$0xff]  ;;  %vm214_vm6 = vcmask 261120   ;;  %s656_s11 = smov 32   ;;  %v657_v45 = vmov 0  }
  0x12   :  { %582 = vmatprep.subr.msk.bf16.mxu0 %vm581_vm2, %v580_v3  ;;  %548 = vmatprep.mubr.msk.bf16.mxu1 %vm655_vm4, %v654_v5  ;;  %v586_v8 = vpack.c.bf16 %v204_v7, %v203_v6  ;;  %v500_v9 = vld [vmem:[%s800_s4] ss:$0 sm:$0xff]  ;;  %v206_v19 = vld [vmem:[%s801_s5 + $0x18] sm:$0xff]  ;;  %v512_v31 = vld [vmem:[%s801_s5 + $0x28] sm:$0xff]  ;;  %s510_s18 = sld [smem:[#allocation2 + $0x1]]  ;;  %vm461_vm7 = vcmask 523264  }
  0x13   :  { %585 = vmatpush3.bf16.msk.msra.mxu0 %vm581_vm2, %v580_v3  ;;  %v613_v17 = vld [vmem:[%s798_s2] sm:$0xff]   ;;  %v590_v20 = vpack.c.bf16 %v206_v19, %v205_v18  ;;  %v513_v41 = vld [vmem:[%s801_s5 + $0x30] sm:$0xff]  ;;  %v514_v42 = vld [vmem:[%s801_s5 + $0x38] sm:$0xff]  ;;  %612 = vset.pattern.permute.xlu0 %v657_v45  ;;  %vm464_vm8 = vcmask 785408  }
  0x14   :  { %587 = vmatprep.subr.bf16.mxu0 %v586_v8  ;;  %v511_v30 = vld [vmem:[%s801_s5 + $0x20] sm:$0xff]  ;;  %v598_v43 = vpack.c.bf16 %v514_v42, %v513_v41  ;;  %v468_v46 = vld [vmem:[%s803_s7 + $0x8] sm:$0xff] }
  0x15   :  { %v594_v32 = vpack.c.bf16 %v512_v31, %v511_v30  ;;  %v506_v33 = vld [vmem:[%s802_s6] ss:$0 sm:$0xff]  ;;  %v516_v56 = vld [vmem:[%s802_s6 + $0x1] ss:$0 sm:$0xff]  ;;  %s659_s6 = smov [#allocation5]  }
  0x16   :  { %544 = vmatmul.mubr.msk.f32.vlgmr.msra.gmra.mrb[0].mxu0 %vm55_vm3, %v45_v4  ;;  %s197_s2 = sadd.f32 1.0, %s196_s26  ;;  %v467_v44 = vld [vmem:[%s803_s7] sm:$0xff]  ;;  %s658_s7 = smov 64  }
  0x17   :  { %589 = vmatpush3.bf16.msra.mxu0 %v586_v8  ;;  %471 = vperm.xlu0 %612, %v467_v44   ;;  %s488_s21 = sshll.u32 %s659_s6, 4  ;;  %s489_s21 = int_to_ptr.vmem [resolvable:$true] %s488_s21 }
  0x18   :  { %591 = vmatprep.subr.bf16.mxu0 %v590_v20  ;;  %v198_v21 = vstv %s197_s2  ;;  %s341_s19 = sadd.f32 1.0, %s510_s18  ;;  %s626_s1 = scalar_lea.vmem %s489_s21, 256 }
  0x19   :  { %p627_p5 = scmp.ne.s32.totalorder %s489_s21, %s626_s1  ;;  %p631_p6 = scmp.lt.s32.totalorder %s489_s21, %s489_s21 }
  0x1a   :  { %v342_v47 = vstv %s341_s19  ;;  %p632_p7 = scmp.lt.s32.totalorder %s626_s1, %s626_s1 }
  0x1b   :  { %593 = vmatpush3.bf16.msra.mxu0 %v590_v20  ;;  %476 = vperm.xlu0 %612, %v468_v46  }
  0x1c   :  { %595 = vmatprep.subr.bf16.mxu0 %v594_v32  ;;  %p633_p8 = por %p632_p7, %p631_p6 }
  0x1e   :  { %p634_p9 = pnand %p633_p8, %p627_p5 }
  0x96   :  { %v472_v0 = vpop.permute.xlu0 %471 }
  0x9a   :  { %v477_v2 = vpop.permute.xlu0 %476 }
  0xe9   :  { %v545_v10 = vpop.f32.mrb[0].mxu0 }
  0xea   :  { %v138_v11 = vadd.f32 %v545_v10, %v500_v9  ;;  %v132_v12 = vpop.f32.mrb[1].mxu0 }
  0xeb   :  { %v133_v13 = vadd.f32 %v500_v9, %v132_v12 }
  0xec   :  { %v732_v14 = vmax.f32 %v138_v11, 0.0 }
  0xed   :  { %v734_v15 = vmax.f32 %v133_v13, 0.0 }
  0xee   :  { %v200_v26 = vmul.f32 %v198_v21, %v732_v14 }
  0xef   :  { %v145_v16 = vpack.c.bf16 %v732_v14, %v734_v15  ;;  %v199_v22 = vmul.f32 %v198_v21, %v734_v15 }
  0xf1   :  { %547 = vmatpush3.bf16.msra.mxu1 %v145_v16 }
  0xf2   :  { %563 = vmatprep.subr.bf16.mxu1 %v654_v5 }
  0xf4   :  { %549 = vmatmul.mubr.msk.bf16.vlgmr.msra.gmra.mrb[0].mxu1 %vm151_vm5, %v613_v17 }
  0xf5   :  { %565 = vmatprep.mubr.msk.bf16.mxu1 %vm655_vm4, %v654_v5 }
 0x1c7   :  { %v189_v23 = vpop.f32.mrb[0].mxu1 }
 0x1c8   :  { %v201_v24 = vadd.f32 %v199_v22, %v189_v23  ;;  %v550_v25 = vpop.f32.mrb[1].mxu1 }
 0x1c9   :  { %v192_v27 = vpop.f32.mrb[2].mxu1 }
 0x1ca   :  { %v202_v28 = vadd.f32 %v200_v26, %v192_v27  ;;  %v551_v29 = vpop.f32.mrb[3].mxu1  ;;  %560 = vmatprep.mubr.msk.f32.mxu0 %vm214_vm6, %v201_v24 }
 0x1cc   :  { %561 = vmatmul.mubr.msk.f32.vlgmr.msra.gmra.mrb[2].mxu0 %vm214_vm6, %v202_v28 }
 0x1cd   :  { %597 = vmatpush3.bf16.msra.mxu0 %v594_v32 }
 0x1ce   :  { %599 = vmatprep.subr.bf16.mxu0 %v598_v43 }
 0x1d1   :  { %601 = vmatpush3.bf16.msra.mxu0 %v598_v43 }
 0x29f   :  { %v562_v34 = vpop.f32.mrb[2].mxu0 }
 0x2a0   :  { %v293_v35 = vadd.f32 %v562_v34, %v506_v33  ;;  %v287_v36 = vpop.f32.mrb[3].mxu0 }
 0x2a1   :  { %v288_v37 = vadd.f32 %v506_v33, %v287_v36 }
 0x2a2   :  { %v297_v38 = vmax.f32 %v293_v35, 0.0 }
 0x2a3   :  { %v296_v39 = vmax.f32 %v288_v37, 0.0 }
 0x2a4   :  { %447 = vrot.lane.b32.xlu1 %v297_v38, %s656_s11  ;;  %v344_v52 = vmul.f32 %v342_v47, %v297_v38 }
 0x2a5   :  { %v298_v40 = vpack.c.bf16 %v297_v38, %v296_v39  ;;  %v343_v48 = vmul.f32 %v342_v47, %v296_v39 }
 0x2a7   :  { %564 = vmatpush3.bf16.msra.mxu1 %v298_v40 }
 0x2a8   :  { %445 = vrot.lane.b32.xlu1 %v296_v39, %s656_s11 }
 0x2aa   :  { %566 = vmatmul.mubr.msk.bf16.vlgmr.msra.gmra.mrb[4].mxu1 %vm151_vm5, %v613_v17 }
 0x316   :  { %v448_v63 = vpop.permute.xlu1 %447 }
 0x317   :  { %v460_v3 = vsel %vm214_vm6, %v732_v14, %v448_v63 }
 0x31a   :  { %v446_v1 = vpop.permute.xlu1 %445 }
 0x31b   :  { %v459_v5 = vsel %vm214_vm6, %v734_v15, %v446_v1 }
 0x37d   :  { %v333_v49 = vpop.f32.mrb[4].mxu1 }
 0x37e   :  { %v345_v50 = vadd.f32 %v343_v48, %v333_v49  ;;  %v567_v51 = vpop.f32.mrb[5].mxu1 }
 0x37f   :  { %v336_v53 = vpop.f32.mrb[6].mxu1 }
 0x380   :  { %v346_v54 = vadd.f32 %v344_v52, %v336_v53  ;;  %577 = vmatprep.mubr.msk.f32.mxu0 %vm214_vm6, %v345_v50  ;;  %v568_v55 = vpop.f32.mrb[7].mxu1 }
 0x382   :  { %578 = vmatmul.mubr.msk.f32.vlgmr.msra.gmra.mrb[4].mxu0 %vm214_vm6, %v346_v54 }
 0x455   :  { %v579_v57 = vpop.f32.mrb[4].mxu0 }
 0x456   :  { %v438_v58 = vadd.f32 %v579_v57, %v516_v56  ;;  %v432_v59 = vpop.f32.mrb[5].mxu0 }
 0x457   :  { %v433_v60 = vadd.f32 %v516_v56, %v432_v59 }
 0x458   :  { %v442_v61 = vmax.f32 %v438_v58, 0.0 }
 0x459   :  { %v441_v62 = vmax.f32 %v433_v60, 0.0 }
 0x45a   :  { %455 = vrot.lane.b32.xlu1 %v442_v61, %s658_s7 }
 0x45b   :  { %453 = vrot.lane.b32.xlu0 %v441_v62, %s658_s7 }
 0x4cc   :  { %v456_v4 = vpop.permute.xlu1 %455 }
 0x4cd   :  { %v463_v6 = vsel %vm461_vm7, %v460_v3, %v456_v4  ;;  %v454_v7 = vpop.permute.xlu0 %453 }
 0x4ce   :  { %v466_v8 = vsel %vm464_vm8, %v463_v6, 0.0  ;;  %v462_v9 = vsel %vm461_vm7, %v459_v5, %v454_v7 }
 0x4cf   :  { %v480_v10 = vmul.f32 %v477_v2, %v466_v8  ;;  %v465_v11 = vsel %vm464_vm8, %v462_v9, 0.0 }
 0x4d0   :  { %v479_v12 = vmul.f32 %v472_v0, %v465_v11 }
 0x4d1   :  { %482 = vst [vmem:[#allocation5 + $0x8] sm:$0xff] %v480_v10 }
 0x4d2   :  { %481 = vst [vmem:[#allocation5] sm:$0xff] %v479_v12 }
 0x4d3   :  { %637 = shalt.err (!%p634_p9)
}
 0x4d4   :  { %s638_s23 = scalar_lea.hbm %s804_s8, 256 }
 0x4d5   :  { %p639_p10 = scmp.ne.s32.totalorder %s804_s8, %s638_s23  ;;  %p642_p11 = scmp.lt.u32.totalorder %s638_s23, %s804_s8 }
 0x4d7   :  { %p644_p12 = pnand %p642_p11, %p639_p10 }
 0x4d9   :  { %647 = shalt.err (!%p644_p12)
}
 0x4da   :  { %s660_s27 = smov 128   ;;  %s661_s28 = smov 8  }
 0x4db   :  { %494 = dma.vmem_to_hbm [thread:$0]  %s489_s21, 256, %s804_s8, [#allocation3], %s660_s27, %s660_s27, %s661_s28  }
 0x4dc   :  { %650 = dma.done.wait [#allocation3], 256  }
 0x4dd   :  { %651 = vsyncadd [#allocation3], 4294967040 }
 0x4de   :  { %498 = vsyncpa [#allocation3], 1 }
 0x4df   :  { %499 = vsyncpa [#allocation4], 1 }

</bundles_post_ra>
